<compile_context>
chip_gen: v7x
topology: tpu7x:2x2x1
jax: 0.10.0
libtpu: 0.0.40
codegen_flags: <defaults>
</compile_context>

<pallas_src>
import jax
import jax.numpy as jnp
from jax.experimental import pallas as pl
from jax.experimental.pallas import tpu as pltpu


def _pick_row_group(n_h, n_w, sublane_align):
    """Smallest divisor r of n_h such that r*n_w is sublane-aligned."""
    for r in range(1, n_h + 1):
        if n_h % r == 0 and (r * n_w) % sublane_align == 0:
            return r
    return n_h


def _make_kernel(channels, patch_h, patch_w, n_w, rows_per_step):
    def kernel(x_ref, o_ref):
        # x_ref: (1, C, rows_per_step, pH, nW, pW)
        # o_ref: (1, rows_per_step * nW, C*pH*pW)
        for ir in range(rows_per_step):
            # Gather all (nW, pW) panels for this patch-row and fuse them into
            # one full-width row slab with a single lane-axis concatenate.
            pieces = [
                x_ref[0, c, ir, ph]            # (nW, pW)
                for c in range(channels)
                for ph in range(patch_h)
            ]
            row = jnp.concatenate(pieces, axis=1)        # (nW, C*pH*pW)
            o_ref[0, ir * n_w:(ir + 1) * n_w, :] = row   # one dense slab store
    return kernel


def image2patch(x, channels, image_size, patch_size):
    """Pallas equivalent of Image2Patch.forward: (B,C,H,W) -> (B, L, C*pH*pW)."""
    if isinstance(image_size, int):
        image_size = (image_size, image_size)
    if isinstance(patch_size, int):
        patch_size = (patch_size, patch_size)
    H, W = image_size
    pH, pW = patch_size
    B, C, Hx, Wx = x.shape
    assert C == channels, "channel mismatch with module config"
    assert (Hx, Wx) == (H, W), "spatial size mismatch with module config"
    assert H % pH == 0 and W % pW == 0, "image_size must be divisible by patch_size"

    nH, nW = H // pH, W // pW
    L = nH * nW
    CPP = C * pH * pW

    itemsize = jnp.dtype(x.dtype).itemsize
    sublane_align = 8 * max(1, 4 // itemsize)       # 8 (f32) / 16 (bf16) / 32 (i8)
    r = _pick_row_group(nH, nW, sublane_align)      # patch-rows per grid step
    G = nH // r

    # Free reshape: split H -> (nH, pH), W -> (nW, pW). No data movement.
    x6 = x.reshape(B, C, nH, pH, nW, pW)

    kernel = _make_kernel(C, pH, pW, nW, r)

    in_block_bytes = C * r * pH * nW * pW * itemsize
    out_block_bytes = r * nW * CPP * itemsize
    vmem_limit = int(min(64 * 1024 * 1024,
                         max(4 * 1024 * 1024,
                             4 * (in_block_bytes + out_block_bytes))))

    return pl.pallas_call(
        kernel,
        out_shape=jax.ShapeDtypeStruct((B, L, CPP), x.dtype),
        grid=(B, G),
        in_specs=[
            pl.BlockSpec((1, C, r, pH, nW, pW),
                         lambda b, g: (b, 0, g, 0, 0, 0)),
        ],
        out_specs=pl.BlockSpec((1, r * nW, CPP),
                               lambda b, g: (b, g, 0)),
        compiler_params=pltpu.CompilerParams(
            dimension_semantics=("parallel", "parallel"),
            vmem_limit_bytes=vmem_limit,
        ),
    )(x6)


def image2patch_ref(x, patch_size):
    """Pure-JAX reference of F.unfold(kernel=stride=patch).swapaxes(1, 2)."""
    if isinstance(patch_size, int):
        patch_size = (patch_size, patch_size)
    B, C, H, W = x.shape
    pH, pW = patch_size
    nH, nW = H // pH, W // pW
    y = x.reshape(B, C, nH, pH, nW, pW)
    y = jnp.transpose(y, (0, 2, 4, 1, 3, 5))        # (B, nH, nW, C, pH, pW)
    return y.reshape(B, nH * nW, C * pH * pW)


if __name__ == "__main__":
    # Small config: batch=2, channels=4, image 16x16, patch 4x4
    # -> L = 16 patches, patch dim = 4*4*4 = 64.
    B = 2
    channels = 4
    image_size = 16
    patch_size = 4

    key = jax.random.PRNGKey(0)
    x = jax.random.normal(key, (B, channels, image_size, image_size),
                          dtype=jnp.float32)

    out = image2patch(x, channels, image_size, patch_size)
    out = jax.block_until_ready(out)

    ref = image2patch_ref(x, patch_size)
    L = (image_size // patch_size) ** 2
    CPP = channels * patch_size * patch_size
    assert out.shape == (B, L, CPP)
    assert jnp.array_equal(out, ref), "mismatch vs reference"

    print("KERNEL_OK")
</pallas_src>

<mosaic_0001>
module attributes {stable_mosaic.version = 11 : i64} {
  func.func @kernel(%arg0: i32, %arg1: i32, %arg2: memref<1x4x2x4x4x4xf32, #tpu.memory_space<vmem>>, %arg3: memref<1x8x64xf32, #tpu.memory_space<vmem>>) attributes {dimension_semantics = [#tpu.dimension_semantics<parallel>, #tpu.dimension_semantics<parallel>], iteration_bounds = array<i64: 2, 2>, scalar_prefetch = 0 : i64, scratch_operands = 0 : i64, tpu.core_type = #tpu.core_type<tc>, window_params = [{transform_indices = @transform_0, window_bounds = array<i64: 1, 4, 2, 4, 4, 4>}, {transform_indices = @transform_1, window_bounds = array<i64: 1, 8, 64>}]} {
    %c0 = arith.constant 0 : index
    %c0_0 = arith.constant 0 : index
    %c0_1 = arith.constant 0 : index
    %c0_2 = arith.constant 0 : index
    %c0_3 = arith.constant 0 : index
    %c0_4 = arith.constant 0 : index
    %0 = vector.load %arg2[%c0, %c0_0, %c0_1, %c0_2, %c0_3, %c0_4] : memref<1x4x2x4x4x4xf32, #tpu.memory_space<vmem>>, vector<1x1x1x1x4x4xf32>
    %1 = vector.shape_cast %0 : vector<1x1x1x1x4x4xf32> to vector<4x4xf32>
    %c0_5 = arith.constant 0 : index
    %c0_6 = arith.constant 0 : index
    %c0_7 = arith.constant 0 : index
    %c1 = arith.constant 1 : index
    %c0_8 = arith.constant 0 : index
    %c0_9 = arith.constant 0 : index
    %2 = vector.load %arg2[%c0_5, %c0_6, %c0_7, %c1, %c0_8, %c0_9] : memref<1x4x2x4x4x4xf32, #tpu.memory_space<vmem>>, vector<1x1x1x1x4x4xf32>
    %3 = vector.shape_cast %2 : vector<1x1x1x1x4x4xf32> to vector<4x4xf32>
    %c0_10 = arith.constant 0 : index
    %c0_11 = arith.constant 0 : index
    %c0_12 = arith.constant 0 : index
    %c2 = arith.constant 2 : index
    %c0_13 = arith.constant 0 : index
    %c0_14 = arith.constant 0 : index
    %4 = vector.load %arg2[%c0_10, %c0_11, %c0_12, %c2, %c0_13, %c0_14] : memref<1x4x2x4x4x4xf32, #tpu.memory_space<vmem>>, vector<1x1x1x1x4x4xf32>
    %5 = vector.shape_cast %4 : vector<1x1x1x1x4x4xf32> to vector<4x4xf32>
    %c0_15 = arith.constant 0 : index
    %c0_16 = arith.constant 0 : index
    %c0_17 = arith.constant 0 : index
    %c3 = arith.constant 3 : index
    %c0_18 = arith.constant 0 : index
    %c0_19 = arith.constant 0 : index
    %6 = vector.load %arg2[%c0_15, %c0_16, %c0_17, %c3, %c0_18, %c0_19] : memref<1x4x2x4x4x4xf32, #tpu.memory_space<vmem>>, vector<1x1x1x1x4x4xf32>
    %7 = vector.shape_cast %6 : vector<1x1x1x1x4x4xf32> to vector<4x4xf32>
    %c0_20 = arith.constant 0 : index
    %c1_21 = arith.constant 1 : index
    %c0_22 = arith.constant 0 : index
    %c0_23 = arith.constant 0 : index
    %c0_24 = arith.constant 0 : index
    %c0_25 = arith.constant 0 : index
    %8 = vector.load %arg2[%c0_20, %c1_21, %c0_22, %c0_23, %c0_24, %c0_25] : memref<1x4x2x4x4x4xf32, #tpu.memory_space<vmem>>, vector<1x1x1x1x4x4xf32>
    %9 = vector.shape_cast %8 : vector<1x1x1x1x4x4xf32> to vector<4x4xf32>
    %c0_26 = arith.constant 0 : index
    %c1_27 = arith.constant 1 : index
    %c0_28 = arith.constant 0 : index
    %c1_29 = arith.constant 1 : index
    %c0_30 = arith.constant 0 : index
    %c0_31 = arith.constant 0 : index
    %10 = vector.load %arg2[%c0_26, %c1_27, %c0_28, %c1_29, %c0_30, %c0_31] : memref<1x4x2x4x4x4xf32, #tpu.memory_space<vmem>>, vector<1x1x1x1x4x4xf32>
    %11 = vector.shape_cast %10 : vector<1x1x1x1x4x4xf32> to vector<4x4xf32>
    %c0_32 = arith.constant 0 : index
    %c1_33 = arith.constant 1 : index
    %c0_34 = arith.constant 0 : index
    %c2_35 = arith.constant 2 : index
    %c0_36 = arith.constant 0 : index
    %c0_37 = arith.constant 0 : index
    %12 = vector.load %arg2[%c0_32, %c1_33, %c0_34, %c2_35, %c0_36, %c0_37] : memref<1x4x2x4x4x4xf32, #tpu.memory_space<vmem>>, vector<1x1x1x1x4x4xf32>
    %13 = vector.shape_cast %12 : vector<1x1x1x1x4x4xf32> to vector<4x4xf32>
    %c0_38 = arith.constant 0 : index
    %c1_39 = arith.constant 1 : index
    %c0_40 = arith.constant 0 : index
    %c3_41 = arith.constant 3 : index
    %c0_42 = arith.constant 0 : index
    %c0_43 = arith.constant 0 : index
    %14 = vector.load %arg2[%c0_38, %c1_39, %c0_40, %c3_41, %c0_42, %c0_43] : memref<1x4x2x4x4x4xf32, #tpu.memory_space<vmem>>, vector<1x1x1x1x4x4xf32>
    %15 = vector.shape_cast %14 : vector<1x1x1x1x4x4xf32> to vector<4x4xf32>
    %c0_44 = arith.constant 0 : index
    %c2_45 = arith.constant 2 : index
    %c0_46 = arith.constant 0 : index
    %c0_47 = arith.constant 0 : index
    %c0_48 = arith.constant 0 : index
    %c0_49 = arith.constant 0 : index
    %16 = vector.load %arg2[%c0_44, %c2_45, %c0_46, %c0_47, %c0_48, %c0_49] : memref<1x4x2x4x4x4xf32, #tpu.memory_space<vmem>>, vector<1x1x1x1x4x4xf32>
    %17 = vector.shape_cast %16 : vector<1x1x1x1x4x4xf32> to vector<4x4xf32>
    %c0_50 = arith.constant 0 : index
    %c2_51 = arith.constant 2 : index
    %c0_52 = arith.constant 0 : index
    %c1_53 = arith.constant 1 : index
    %c0_54 = arith.constant 0 : index
    %c0_55 = arith.constant 0 : index
    %18 = vector.load %arg2[%c0_50, %c2_51, %c0_52, %c1_53, %c0_54, %c0_55] : memref<1x4x2x4x4x4xf32, #tpu.memory_space<vmem>>, vector<1x1x1x1x4x4xf32>
    %19 = vector.shape_cast %18 : vector<1x1x1x1x4x4xf32> to vector<4x4xf32>
    %c0_56 = arith.constant 0 : index
    %c2_57 = arith.constant 2 : index
    %c0_58 = arith.constant 0 : index
    %c2_59 = arith.constant 2 : index
    %c0_60 = arith.constant 0 : index
    %c0_61 = arith.constant 0 : index
    %20 = vector.load %arg2[%c0_56, %c2_57, %c0_58, %c2_59, %c0_60, %c0_61] : memref<1x4x2x4x4x4xf32, #tpu.memory_space<vmem>>, vector<1x1x1x1x4x4xf32>
    %21 = vector.shape_cast %20 : vector<1x1x1x1x4x4xf32> to vector<4x4xf32>
    %c0_62 = arith.constant 0 : index
    %c2_63 = arith.constant 2 : index
    %c0_64 = arith.constant 0 : index
    %c3_65 = arith.constant 3 : index
    %c0_66 = arith.constant 0 : index
    %c0_67 = arith.constant 0 : index
    %22 = vector.load %arg2[%c0_62, %c2_63, %c0_64, %c3_65, %c0_66, %c0_67] : memref<1x4x2x4x4x4xf32, #tpu.memory_space<vmem>>, vector<1x1x1x1x4x4xf32>
    %23 = vector.shape_cast %22 : vector<1x1x1x1x4x4xf32> to vector<4x4xf32>
    %c0_68 = arith.constant 0 : index
    %c3_69 = arith.constant 3 : index
    %c0_70 = arith.constant 0 : index
    %c0_71 = arith.constant 0 : index
    %c0_72 = arith.constant 0 : index
    %c0_73 = arith.constant 0 : index
    %24 = vector.load %arg2[%c0_68, %c3_69, %c0_70, %c0_71, %c0_72, %c0_73] : memref<1x4x2x4x4x4xf32, #tpu.memory_space<vmem>>, vector<1x1x1x1x4x4xf32>
    %25 = vector.shape_cast %24 : vector<1x1x1x1x4x4xf32> to vector<4x4xf32>
    %c0_74 = arith.constant 0 : index
    %c3_75 = arith.constant 3 : index
    %c0_76 = arith.constant 0 : index
    %c1_77 = arith.constant 1 : index
    %c0_78 = arith.constant 0 : index
    %c0_79 = arith.constant 0 : index
    %26 = vector.load %arg2[%c0_74, %c3_75, %c0_76, %c1_77, %c0_78, %c0_79] : memref<1x4x2x4x4x4xf32, #tpu.memory_space<vmem>>, vector<1x1x1x1x4x4xf32>
    %27 = vector.shape_cast %26 : vector<1x1x1x1x4x4xf32> to vector<4x4xf32>
    %c0_80 = arith.constant 0 : index
    %c3_81 = arith.constant 3 : index
    %c0_82 = arith.constant 0 : index
    %c2_83 = arith.constant 2 : index
    %c0_84 = arith.constant 0 : index
    %c0_85 = arith.constant 0 : index
    %28 = vector.load %arg2[%c0_80, %c3_81, %c0_82, %c2_83, %c0_84, %c0_85] : memref<1x4x2x4x4x4xf32, #tpu.memory_space<vmem>>, vector<1x1x1x1x4x4xf32>
    %29 = vector.shape_cast %28 : vector<1x1x1x1x4x4xf32> to vector<4x4xf32>
    %c0_86 = arith.constant 0 : index
    %c3_87 = arith.constant 3 : index
    %c0_88 = arith.constant 0 : index
    %c3_89 = arith.constant 3 : index
    %c0_90 = arith.constant 0 : index
    %c0_91 = arith.constant 0 : index
    %30 = vector.load %arg2[%c0_86, %c3_87, %c0_88, %c3_89, %c0_90, %c0_91] : memref<1x4x2x4x4x4xf32, #tpu.memory_space<vmem>>, vector<1x1x1x1x4x4xf32>
    %31 = vector.shape_cast %30 : vector<1x1x1x1x4x4xf32> to vector<4x4xf32>
    %32 = tpu.concatenate %1, %3, %5, %7, %9, %11, %13, %15, %17, %19, %21, %23, %25, %27, %29, %31 in 1 : vector<4x4xf32>, vector<4x4xf32>, vector<4x4xf32>, vector<4x4xf32>, vector<4x4xf32>, vector<4x4xf32>, vector<4x4xf32>, vector<4x4xf32>, vector<4x4xf32>, vector<4x4xf32>, vector<4x4xf32>, vector<4x4xf32>, vector<4x4xf32>, vector<4x4xf32>, vector<4x4xf32>, vector<4x4xf32> -> vector<4x64xf32>
    %c0_92 = arith.constant 0 : index
    %c0_93 = arith.constant 0 : index
    %c0_94 = arith.constant 0 : index
    %33 = vector.load %arg3[%c0_92, %c0_93, %c0_94] : memref<1x8x64xf32, #tpu.memory_space<vmem>>, vector<1x4x64xf32>
    %34 = vector.shape_cast %33 : vector<1x4x64xf32> to vector<4x64xf32>
    %35 = vector.shape_cast %32 : vector<4x64xf32> to vector<1x4x64xf32>
    tpu.vector_store %arg3[%c0_92, %c0_93, %c0_94], %35 {strides = array<i32>} : memref<1x8x64xf32, #tpu.memory_space<vmem>>, vector<1x4x64xf32>,
    %c0_95 = arith.constant 0 : index
    %c0_96 = arith.constant 0 : index
    %c1_97 = arith.constant 1 : index
    %c0_98 = arith.constant 0 : index
    %c0_99 = arith.constant 0 : index
    %c0_100 = arith.constant 0 : index
    %36 = vector.load %arg2[%c0_95, %c0_96, %c1_97, %c0_98, %c0_99, %c0_100] : memref<1x4x2x4x4x4xf32, #tpu.memory_space<vmem>>, vector<1x1x1x1x4x4xf32>
    %37 = vector.shape_cast %36 : vector<1x1x1x1x4x4xf32> to vector<4x4xf32>
    %c0_101 = arith.constant 0 : index
    %c0_102 = arith.constant 0 : index
    %c1_103 = arith.constant 1 : index
    %c1_104 = arith.constant 1 : index
    %c0_105 = arith.constant 0 : index
    %c0_106 = arith.constant 0 : index
    %38 = vector.load %arg2[%c0_101, %c0_102, %c1_103, %c1_104, %c0_105, %c0_106] : memref<1x4x2x4x4x4xf32, #tpu.memory_space<vmem>>, vector<1x1x1x1x4x4xf32>
    %39 = vector.shape_cast %38 : vector<1x1x1x1x4x4xf32> to vector<4x4xf32>
    %c0_107 = arith.constant 0 : index
    %c0_108 = arith.constant 0 : index
    %c1_109 = arith.constant 1 : index
    %c2_110 = arith.constant 2 : index
    %c0_111 = arith.constant 0 : index
    %c0_112 = arith.constant 0 : index
    %40 = vector.load %arg2[%c0_107, %c0_108, %c1_109, %c2_110, %c0_111, %c0_112] : memref<1x4x2x4x4x4xf32, #tpu.memory_space<vmem>>, vector<1x1x1x1x4x4xf32>
    %41 = vector.shape_cast %40 : vector<1x1x1x1x4x4xf32> to vector<4x4xf32>
    %c0_113 = arith.constant 0 : index
    %c0_114 = arith.constant 0 : index
    %c1_115 = arith.constant 1 : index
    %c3_116 = arith.constant 3 : index
    %c0_117 = arith.constant 0 : index
    %c0_118 = arith.constant 0 : index
    %42 = vector.load %arg2[%c0_113, %c0_114, %c1_115, %c3_116, %c0_117, %c0_118] : memref<1x4x2x4x4x4xf32, #tpu.memory_space<vmem>>, vector<1x1x1x1x4x4xf32>
    %43 = vector.shape_cast %42 : vector<1x1x1x1x4x4xf32> to vector<4x4xf32>
    %c0_119 = arith.constant 0 : index
    %c1_120 = arith.constant 1 : index
    %c1_121 = arith.constant 1 : index
    %c0_122 = arith.constant 0 : index
    %c0_123 = arith.constant 0 : index
    %c0_124 = arith.constant 0 : index
    %44 = vector.load %arg2[%c0_119, %c1_120, %c1_121, %c0_122, %c0_123, %c0_124] : memref<1x4x2x4x4x4xf32, #tpu.memory_space<vmem>>, vector<1x1x1x1x4x4xf32>
    %45 = vector.shape_cast %44 : vector<1x1x1x1x4x4xf32> to vector<4x4xf32>
    %c0_125 = arith.constant 0 : index
    %c1_126 = arith.constant 1 : index
    %c1_127 = arith.constant 1 : index
    %c1_128 = arith.constant 1 : index
    %c0_129 = arith.constant 0 : index
    %c0_130 = arith.constant 0 : index
    %46 = vector.load %arg2[%c0_125, %c1_126, %c1_127, %c1_128, %c0_129, %c0_130] : memref<1x4x2x4x4x4xf32, #tpu.memory_space<vmem>>, vector<1x1x1x1x4x4xf32>
    %47 = vector.shape_cast %46 : vector<1x1x1x1x4x4xf32> to vector<4x4xf32>
    %c0_131 = arith.constant 0 : index
    %c1_132 = arith.constant 1 : index
    %c1_133 = arith.constant 1 : index
    %c2_134 = arith.constant 2 : index
    %c0_135 = arith.constant 0 : index
    %c0_136 = arith.constant 0 : index
    %48 = vector.load %arg2[%c0_131, %c1_132, %c1_133, %c2_134, %c0_135, %c0_136] : memref<1x4x2x4x4x4xf32, #tpu.memory_space<vmem>>, vector<1x1x1x1x4x4xf32>
    %49 = vector.shape_cast %48 : vector<1x1x1x1x4x4xf32> to vector<4x4xf32>
    %c0_137 = arith.constant 0 : index
    %c1_138 = arith.constant 1 : index
    %c1_139 = arith.constant 1 : index
    %c3_140 = arith.constant 3 : index
    %c0_141 = arith.constant 0 : index
    %c0_142 = arith.constant 0 : index
    %50 = vector.load %arg2[%c0_137, %c1_138, %c1_139, %c3_140, %c0_141, %c0_142] : memref<1x4x2x4x4x4xf32, #tpu.memory_space<vmem>>, vector<1x1x1x1x4x4xf32>
    %51 = vector.shape_cast %50 : vector<1x1x1x1x4x4xf32> to vector<4x4xf32>
    %c0_143 = arith.constant 0 : index
    %c2_144 = arith.constant 2 : index
    %c1_145 = arith.constant 1 : index
    %c0_146 = arith.constant 0 : index
    %c0_147 = arith.constant 0 : index
    %c0_148 = arith.constant 0 : index
    %52 = vector.load %arg2[%c0_143, %c2_144, %c1_145, %c0_146, %c0_147, %c0_148] : memref<1x4x2x4x4x4xf32, #tpu.memory_space<vmem>>, vector<1x1x1x1x4x4xf32>
    %53 = vector.shape_cast %52 : vector<1x1x1x1x4x4xf32> to vector<4x4xf32>
    %c0_149 = arith.constant 0 : index
    %c2_150 = arith.constant 2 : index
    %c1_151 = arith.constant 1 : index
    %c1_152 = arith.constant 1 : index
    %c0_153 = arith.constant 0 : index
    %c0_154 = arith.constant 0 : index
    %54 = vector.load %arg2[%c0_149, %c2_150, %c1_151, %c1_152, %c0_153, %c0_154] : memref<1x4x2x4x4x4xf32, #tpu.memory_space<vmem>>, vector<1x1x1x1x4x4xf32>
    %55 = vector.shape_cast %54 : vector<1x1x1x1x4x4xf32> to vector<4x4xf32>
    %c0_155 = arith.constant 0 : index
    %c2_156 = arith.constant 2 : index
    %c1_157 = arith.constant 1 : index
    %c2_158 = arith.constant 2 : index
    %c0_159 = arith.constant 0 : index
    %c0_160 = arith.constant 0 : index
    %56 = vector.load %arg2[%c0_155, %c2_156, %c1_157, %c2_158, %c0_159, %c0_160] : memref<1x4x2x4x4x4xf32, #tpu.memory_space<vmem>>, vector<1x1x1x1x4x4xf32>
    %57 = vector.shape_cast %56 : vector<1x1x1x1x4x4xf32> to vector<4x4xf32>
    %c0_161 = arith.constant 0 : index
    %c2_162 = arith.constant 2 : index
    %c1_163 = arith.constant 1 : index
    %c3_164 = arith.constant 3 : index
    %c0_165 = arith.constant 0 : index
    %c0_166 = arith.constant 0 : index
    %58 = vector.load %arg2[%c0_161, %c2_162, %c1_163, %c3_164, %c0_165, %c0_166] : memref<1x4x2x4x4x4xf32, #tpu.memory_space<vmem>>, vector<1x1x1x1x4x4xf32>
    %59 = vector.shape_cast %58 : vector<1x1x1x1x4x4xf32> to vector<4x4xf32>
    %c0_167 = arith.constant 0 : index
    %c3_168 = arith.constant 3 : index
    %c1_169 = arith.constant 1 : index
    %c0_170 = arith.constant 0 : index
    %c0_171 = arith.constant 0 : index
    %c0_172 = arith.constant 0 : index
    %60 = vector.load %arg2[%c0_167, %c3_168, %c1_169, %c0_170, %c0_171, %c0_172] : memref<1x4x2x4x4x4xf32, #tpu.memory_space<vmem>>, vector<1x1x1x1x4x4xf32>
    %61 = vector.shape_cast %60 : vector<1x1x1x1x4x4xf32> to vector<4x4xf32>
    %c0_173 = arith.constant 0 : index
    %c3_174 = arith.constant 3 : index
    %c1_175 = arith.constant 1 : index
    %c1_176 = arith.constant 1 : index
    %c0_177 = arith.constant 0 : index
    %c0_178 = arith.constant 0 : index
    %62 = vector.load %arg2[%c0_173, %c3_174, %c1_175, %c1_176, %c0_177, %c0_178] : memref<1x4x2x4x4x4xf32, #tpu.memory_space<vmem>>, vector<1x1x1x1x4x4xf32>
    %63 = vector.shape_cast %62 : vector<1x1x1x1x4x4xf32> to vector<4x4xf32>
    %c0_179 = arith.constant 0 : index
    %c3_180 = arith.constant 3 : index
    %c1_181 = arith.constant 1 : index
    %c2_182 = arith.constant 2 : index
    %c0_183 = arith.constant 0 : index
    %c0_184 = arith.constant 0 : index
    %64 = vector.load %arg2[%c0_179, %c3_180, %c1_181, %c2_182, %c0_183, %c0_184] : memref<1x4x2x4x4x4xf32, #tpu.memory_space<vmem>>, vector<1x1x1x1x4x4xf32>
    %65 = vector.shape_cast %64 : vector<1x1x1x1x4x4xf32> to vector<4x4xf32>
    %c0_185 = arith.constant 0 : index
    %c3_186 = arith.constant 3 : index
    %c1_187 = arith.constant 1 : index
    %c3_188 = arith.constant 3 : index
    %c0_189 = arith.constant 0 : index
    %c0_190 = arith.constant 0 : index
    %66 = vector.load %arg2[%c0_185, %c3_186, %c1_187, %c3_188, %c0_189, %c0_190] : memref<1x4x2x4x4x4xf32, #tpu.memory_space<vmem>>, vector<1x1x1x1x4x4xf32>
    %67 = vector.shape_cast %66 : vector<1x1x1x1x4x4xf32> to vector<4x4xf32>
    %68 = tpu.concatenate %37, %39, %41, %43, %45, %47, %49, %51, %53, %55, %57, %59, %61, %63, %65, %67 in 1 : vector<4x4xf32>, vector<4x4xf32>, vector<4x4xf32>, vector<4x4xf32>, vector<4x4xf32>, vector<4x4xf32>, vector<4x4xf32>, vector<4x4xf32>, vector<4x4xf32>, vector<4x4xf32>, vector<4x4xf32>, vector<4x4xf32>, vector<4x4xf32>, vector<4x4xf32>, vector<4x4xf32>, vector<4x4xf32> -> vector<4x64xf32>
    %c0_191 = arith.constant 0 : index
    %c4 = arith.constant 4 : index
    %c0_192 = arith.constant 0 : index
    %69 = vector.load %arg3[%c0_191, %c4, %c0_192] : memref<1x8x64xf32, #tpu.memory_space<vmem>>, vector<1x4x64xf32>
    %70 = vector.shape_cast %69 : vector<1x4x64xf32> to vector<4x64xf32>
    %71 = vector.shape_cast %68 : vector<4x64xf32> to vector<1x4x64xf32>
    tpu.vector_store %arg3[%c0_191, %c4, %c0_192], %71 {strides = array<i32>} : memref<1x8x64xf32, #tpu.memory_space<vmem>>, vector<1x4x64xf32>,
    return
  }
  func.func @transform_0(%arg0: i32, %arg1: i32) -> (i32, i32, i32, i32, i32, i32) {
    %c0_i32 = arith.constant 0 : i32
    %c0_i32_0 = arith.constant 0 : i32
    %c0_i32_1 = arith.constant 0 : i32
    %c0_i32_2 = arith.constant 0 : i32
    %c0_i32_3 = arith.constant 0 : i32
    return %arg0, %c0_i32, %arg1, %c0_i32_0, %c0_i32_1, %c0_i32_2 : i32, i32, i32, i32, i32, i32
  }
  func.func @transform_1(%arg0: i32, %arg1: i32) -> (i32, i32, i32) {
    %c0_i32 = arith.constant 0 : i32
    %c0_i32_0 = arith.constant 0 : i32
    return %arg0, %arg1, %c0_i32 : i32, i32, i32
  }
}

</mosaic_0001>

<bundles_post_ra>
// kernel: tpu_custom_call.1
= control target key start
LH: loop header
LB: loop body
LE: loop exit
PB: predicated region body
PF: predicated region fallthrough
CT: control target
= control target key end

     0   :  { %6 = vsyncpa [#allocation3], 0  ;;  %s1003_s0 = inlined_call_operand.hbm [shape: f32[2,4,4,4,4,4], index: 0, kind: input, shape index: {}]   ;;  %s1004_s1 = inlined_call_operand.hbm [shape: f32[2,16,64], index: 1, kind: output, shape index: {}]  }
   0x1   :  { %8 = vsyncpa [#allocation3 + $0x1], 0 }
   0x2   :  { %9 = vsyncpa [#allocation4], 0 }
   0x3   :  { %11 = vsyncpa [#allocation4 + $0x1], 0  ;;  %s797_s6 = smov 0   ;;  %s799_s7 = smov 0  }
   0x4   :  { %s801_s8 = smov 0   ;;  %s803_s9 = smov 0  }
   0x5   :  { %s805_s10 = smov 0   ;;  %s807_s11 = smov 0  }
   0x6   :  { %s809_s12 = smov 0   ;;  %s811_s13 = smov 0  }
   0x7 LB: > { %s513_s14 = sadd.s32 4294967295, %s763_s13   ;;  %s514_s15 = sadd.s32 4294967294, %s763_s13   ;;  %s763_s13 = sphi %s811_s13, %s17_s13   ;;  %s759_s12 = sphi %s809_s12, %s1015_s12   ;;  %s755_s11 = sphi %s807_s11, %s1014_s11   ;;  %s751_s10 = sphi %s805_s10, %s1013_s10   ;;  %s747_s9 = sphi %s803_s9, %s1012_s9   ;;  %s743_s8 = sphi %s801_s8, %s1011_s8   ;;  %s739_s7 = sphi %s799_s7, %s1010_s7   ;;  %s735_s6 = sphi %s797_s6, %s1009_s6  }
   0x8   : > { %s26_s16 = sadd.s32 1, %s755_s11  ;;  %s29_s17 = sadd.s32 1, %s759_s12 }
   0x9   : > { %p27_p0 = scmp.ge.s32.totalorder %s26_s16, 2  ;;  %p45_p1 = scmp.ne.s32.totalorder %s743_s8, %s739_s7 }
   0xa   : > { %p46_p2 = scmp.eq.s32.totalorder %s763_s13, 0  ;;  %p51_p5 = scmp.ne.s32.totalorder %s739_s7, %s735_s6 }
   0xb   : > { %s1017_s16 = smov (%p27_p0, %s26_s16), 0  ;;  %s1019_s17 = smov (!%p27_p0, %s29_s17), %s759_s12 }
   0xc   : > { %s34_s18 = ssub.s32 %s755_s11, %s1017_s16  ;;  %p849_p3 = por %p46_p2, %p45_p1 }
   0xd   : > { %p31_p4 = scmp.ge.s32.totalorder %s1019_s17, 2  ;;  %p52_p6 = scmp.eq.s32.totalorder %s513_s14, 0 }
   0xe   : > { %p77_p7 = scmp.eq.s32.totalorder %s513_s14, 3  ;;  %p83_p10 = scmp.eq.s32.totalorder %s514_s15, 3 }
   0xf   : > { %s1021_s17 = smov (%p31_p4, %s1019_s17), 0  ;;  %p857_p8 = por %p52_p6, %p51_p5 }
  0x10   : > { %p861_p9 = por %p77_p7, %p45_p1  ;;  %s33_s22 = ssub.s32 %s759_s12, %s1021_s17 }
  0x11   : > { %s35_s23 = sor.u32 %s34_s18, %s33_s22  ;;  %s38_s24 = sadd.s32 1, %s743_s8 }
  0x12   : > { %p36_p11 = scmp.eq.s32.totalorder %s35_s23, 0  ;;  %p868_p12 = por %p83_p10, %p51_p5 }
  0x13   : > { %p516_p13 = scmp.ge.s32.totalorder %s763_s13, 4 }
  0x14   : > { %s873_s26 = scalar_select %p36_p11, %s743_s8, %s38_s24  }
  0x15   : > { %99 = sbr.rel (%p516_p13) target bundleno = 44 (0x2c), region = 16 }
  0x1c   : > { %s103_s27 = sand.u32 1, %s743_s8   ;;  %s563_s28 = sshll.u32 %s755_s11, 3 }
  0x1d   : > { %s517_s29 = sshll.u32 %s103_s27, 7  ;;  %s520_s30 = sshll.u32 %s759_s12, 6 }
  0x1e   : > { %s114_s2 = sadd.s32 %s563_s28, %s520_s30  ;;  %s107_s3 = scalar_lea.vmem [#allocation2], %s517_s29 }
  0x1f   : > { %s129_s4 = sshll.u32 %s107_s3, 4  ;;  %s521_s5 = sshll.u32 %s114_s2, 6  ;;  %s130_s4 = int_to_ptr.vmem [resolvable:$true] %s129_s4 }
  0x20   : > { %s564_s14 = scalar_select %p849_p3, [#allocation0], [#allocation8] }
  0x21   : > { %s765_s15 = smov 1024   ;;  %s766_s22 = smov 512  }
  0x22   : > { %565 = sst [smem:[#allocation7]] (%p849_p3), %s765_s15  ;;  %s767_s23 = smov 8  }
  0x23   : > { %s121_s18 = sld [smem:[%s564_s14]]   ;;  %s768_s24 = smov 64  }
  0x24   : > { %566 = sst [smem:[#allocation7 + $0x1]] (%p849_p3), %s766_s22  ;;  %s116_s30 = scalar_lea.hbm %s1003_s0, %s521_s5 }
  0x25   : > { %567 = sst [smem:[#allocation7 + $0x2]] (%p849_p3), %s767_s23  ;;  %s769_s2 = smov 4  }
  0x26   : > { %568 = sst [smem:[#allocation7 + $0x3]] (%p849_p3), %s768_s24  ;;  %s104_s15 = scalar_lea.sflag [#allocation3], %s103_s27 }
  0x27   : > { %569 = sst [smem:[#allocation7 + $0x4]] (%p849_p3), %s768_s24  ;;  %s770_s22 = smov [#allocation6]  }
  0x28   : > { %570 = sst [smem:[#allocation7 + $0x5]] (%p849_p3), %s769_s2 }
  0x29   : > { %s522_s3 = sshll.u32 %s121_s18, 26 }
  0x2a   : > { %s523_s14 = sadd.s32 134217728, %s522_s3 }
  0x2b   : > { %571 = dma.general (%p849_p3), %s116_s30, 2048, %s130_s4, %s104_s15, %s770_s22, [#allocation7], %s523_s14, 0  }
  0x2c PF: > { %p524_p0 = scmp.ge.s32.totalorder %s763_s13, 1  ;;  %p150_p1 = scmp.lt.s32.totalorder %s763_s13, 5 }
  0x2e   : > { %p151_p2 = pnand %p524_p0, %p150_p1 }
  0x2f   : > { %s901_s5 = sand.u32 (!%p151_p2), 1, %s739_s7  }
  0x30   : > { %154 = sbr.rel (%p151_p2) target bundleno = 244 (0xf4), region = 24  ;;  %s525_s23 = sshll.u32 (!%p151_p2), %s901_s5, 7 }
  0x31   : > { %s157_s18 = scalar_lea.sflag (!%p151_p2), [#allocation3], %s901_s5  ;;  %s905_s24 = scalar_lea.vmem (!%p151_p2), [#allocation2], %s525_s23 }
  0x37   : > { %726 = dma.done.wait (%p857_p8), %s157_s18, 2048  }
  0x38   : > { %728 = vsyncadd (%p857_p8), %s157_s18, 4294965248  ;;  %v528_v0 = vld [vmem:[%s905_s24 + $0x8] sm:$0xf]  ;;  %v527_v1 = vld [vmem:[%s905_s24 + $0x4] sm:$0xf]  ;;  %s771_s19 = smov 8  }
  0x39   : > { %216 = vrot.lane.b32.xlu1 %v528_v0, %s771_s19  ;;  %s772_s27 = smov 4   ;;  %v544_v2 = vld [vmem:[%s905_s24 + $0x18] sm:$0xf]  ;;  %v543_v3 = vld [vmem:[%s905_s24 + $0x14] sm:$0xf]  ;;  %s773_s20 = smov 12  }
  0x3a   : > { %212 = vrot.lane.b32.xlu0 %v527_v1, %s772_s27  ;;  %v545_v4 = vld [vmem:[%s905_s24 + $0x1c] sm:$0xf]  ;;  %v529_v5 = vld [vmem:[%s905_s24 + $0xc] sm:$0xf]  ;;  %v546_v6 = vld [vmem:[%s905_s24 + $0x30] sm:$0xf] }
  0x3b   : > { %v530_v7 = vld [vmem:[%s905_s24 + $0x20] sm:$0xf]  ;;  %s774_s4 = smov 16   ;;  %v547_v8 = vld [vmem:[%s905_s24 + $0x34] sm:$0xf]  ;;  %s775_s28 = smov 20  }
  0x3c   : > { %v531_v9 = vld [vmem:[%s905_s24 + $0x24] sm:$0xf]  ;;  %v548_v10 = vld [vmem:[%s905_s24 + $0x38] sm:$0xf]  ;;  %v532_v11 = vld [vmem:[%s905_s24 + $0x28] sm:$0xf] }
  0x3d   : > { %340 = vrot.lane.b32.xlu1 %v544_v2, %s771_s19  ;;  %s776_s29 = smov 24   ;;  %v549_v12 = vld [vmem:[%s905_s24 + $0x3c] sm:$0xf]  ;;  %v533_v13 = vld [vmem:[%s905_s24 + $0x2c] sm:$0xf]  ;;  %s777_s30 = smov 28  }
  0x3e   : > { %336 = vrot.lane.b32.xlu0 %v543_v3, %s772_s27  ;;  %v550_v14 = vld [vmem:[%s905_s24 + $0x50] sm:$0xf]  ;;  %v534_v15 = vld [vmem:[%s905_s24 + $0x40] sm:$0xf]  ;;  %s778_s2 = smov 32   ;;  %s779_s3 = smov 36  }
  0x3f   : > { %v551_v16 = vld [vmem:[%s905_s24 + $0x54] sm:$0xf]  ;;  %v535_v17 = vld [vmem:[%s905_s24 + $0x44] sm:$0xf]  ;;  %v552_v18 = vld [vmem:[%s905_s24 + $0x58] sm:$0xf] }
  0x40   : > { %v536_v19 = vld [vmem:[%s905_s24 + $0x48] sm:$0xf]  ;;  %s780_s14 = smov 40   ;;  %v553_v20 = vld [vmem:[%s905_s24 + $0x5c] sm:$0xf]  ;;  %s781_s15 = smov 44  }
  0x41   : > { %344 = vrot.lane.b32.xlu1 %v545_v4, %s773_s20  ;;  %v537_v21 = vld [vmem:[%s905_s24 + $0x4c] sm:$0xf]  ;;  %v554_v22 = vld [vmem:[%s905_s24 + $0x70] sm:$0xf]  ;;  %v538_v23 = vld [vmem:[%s905_s24 + $0x60] sm:$0xf] }
  0x42   : > { %220 = vrot.lane.b32.xlu0 %v529_v5, %s773_s20  ;;  %s782_s22 = smov 48   ;;  %v555_v24 = vld [vmem:[%s905_s24 + $0x74] sm:$0xf]  ;;  %v539_v25 = vld [vmem:[%s905_s24 + $0x64] sm:$0xf]  ;;  %s783_s23 = smov 52  }
  0x43   : > { %v556_v26 = vld [vmem:[%s905_s24 + $0x78] sm:$0xf]  ;;  %v540_v27 = vld [vmem:[%s905_s24 + $0x68] sm:$0xf]  ;;  %s784_s18 = smov 56   ;;  %s785_s19 = smov 60  }
  0x44   : > { %v557_v28 = vld [vmem:[%s905_s24 + $0x7c] sm:$0xf]  ;;  %v541_v29 = vld [vmem:[%s905_s24 + $0x6c] sm:$0xf]  ;;  %vm271_vm0 = vcmask 31744   ;;  %vm273_vm1 = vcmask 64512  }
  0x45   : > { %348 = vrot.lane.b32.xlu1 %v546_v6, %s774_s4  ;;  %v180_v50 = vld [vmem:[%s905_s24] sm:$0xf]  ;;  %v542_v51 = vld [vmem:[%s905_s24 + $0x10] sm:$0xf]  ;;  %vm275_vm2 = vcmask 97280   ;;  %vm277_vm3 = vcmask 130048  }
  0x46   : > { %224 = vrot.lane.b32.xlu0 %v530_v7, %s774_s4  ;;  %vm279_vm4 = vcmask 162816   ;;  %vm281_vm5 = vcmask 195584   ;;  %vm283_vm6 = vcmask 228352   ;;  %vm285_vm7 = vcmask 261120   ;;  %s526_s24 = sshll.u32 %s901_s5, 3  ;;  %s559_s27 = sshll.u32 %s751_s10, 1 }
  0x47   : > { %vm287_vm8 = vcmask 293888   ;;  %vm289_vm9 = vcmask 326656   ;;  %vm291_vm10 = vcmask 359424   ;;  %s423_s20 = sadd.s32 %s747_s9, %s559_s27  ;;  %vm293_vm11 = vcmask 392192   ;;  %s178_s4 = scalar_lea.vmem [#allocation5], %s526_s24 }
  0x48   : > { %vm295_vm12 = vcmask 424960   ;;  %vm297_vm13 = vcmask 457728   ;;  %s560_s10 = sshll.u32 %s423_s20, 7  ;;  %vm299_vm14 = vcmask 490496   ;;  %vm301_vm15 = vcmask 519168  }
  0x49   : > { %352 = vrot.lane.b32.xlu1 %v547_v8, %s775_s28 }
  0x4a   : > { %228 = vrot.lane.b32.xlu0 %v531_v9, %s775_s28  ;;  %s427_s28 = sshll.u32 %s178_s4, 4  ;;  %s951_s28 = int_to_ptr.vmem [resolvable:$true] %s427_s28 }
  0x4d   : > { %356 = vrot.lane.b32.xlu1 %v548_v10, %s776_s29 }
  0x4e   : > { %232 = vrot.lane.b32.xlu0 %v532_v11, %s776_s29 }
  0x51   : > { %360 = vrot.lane.b32.xlu1 %v549_v12, %s777_s30 }
  0x52   : > { %236 = vrot.lane.b32.xlu0 %v533_v13, %s777_s30  ;;  %s949_s30 = scalar_lea.hbm %s1004_s1, %s560_s10 }
  0x55   : > { %364 = vrot.lane.b32.xlu1 %v550_v14, %s778_s2 }
  0x56   : > { %240 = vrot.lane.b32.xlu0 %v534_v15, %s778_s2  ;;  %s412_s2 = scalar_lea.sflag [#allocation4], %s901_s5 }
  0x59   : > { %368 = vrot.lane.b32.xlu1 %v551_v16, %s779_s3 }
  0x5a   : > { %244 = vrot.lane.b32.xlu0 %v535_v17, %s779_s3  ;;  %s665_s3 = scalar_lea.vmem %s951_s28, 128 }
  0x5b   : > { %p666_p3 = scmp.ne.s32.totalorder %s951_s28, %s665_s3 }
  0x5d   : > { %372 = vrot.lane.b32.xlu1 %v552_v18, %s780_s14  ;;  %p667_p4 = pnand %p666_p3, %p861_p9 }
  0x5e   : > { %248 = vrot.lane.b32.xlu0 %v536_v19, %s780_s14  ;;  %s786_s14 = smov [#allocation5]  }
  0x5f   : > { %p668_p5 = pneg %p667_p4 }
  0x61   : > { %376 = vrot.lane.b32.xlu1 %v553_v20, %s781_s15 }
  0x62   : > { %252 = vrot.lane.b32.xlu0 %v537_v21, %s781_s15  ;;  %s669_s15 = sshll.u32 %s786_s14, 4  ;;  %s670_s15 = int_to_ptr.vmem [resolvable:$false] %s669_s15 }
  0x63   : > { %p672_p6 = scmp.lt.s32.totalorder %s951_s28, %s670_s15 }
  0x65   : > { %380 = vrot.lane.b32.xlu1 %v554_v22, %s782_s22 }
  0x66   : > { %256 = vrot.lane.b32.xlu0 %v538_v23, %s782_s22  ;;  %s671_s22 = scalar_lea.vmem %s670_s15, 256 }
  0x67   : > { %p673_p7 = scmp.lt.s32.totalorder %s671_s22, %s665_s3 }
  0x69   : > { %384 = vrot.lane.b32.xlu1 %v555_v24, %s783_s23  ;;  %p674_p8 = por %p673_p7, %p672_p6 }
  0x6a   : > { %260 = vrot.lane.b32.xlu0 %v539_v25, %s783_s23 }
  0x6b   : > { %p675_p10 = pnand %p674_p8, %p668_p5 }
  0x6d   : > { %388 = vrot.lane.b32.xlu1 %v556_v26, %s784_s18 }
  0x6e   : > { %264 = vrot.lane.b32.xlu0 %v540_v27, %s784_s18 }
  0x71   : > { %392 = vrot.lane.b32.xlu1 %v557_v28, %s785_s19 }
  0x72   : > { %268 = vrot.lane.b32.xlu0 %v541_v29, %s785_s19 }
  0xab   : > { %v217_v30 = vpop.permute.xlu1 %216 }
  0xac   : > { %v213_v31 = vpop.permute.xlu0 %212 }
  0xad   : > { %v272_v54 = vsel %vm271_vm0, %v180_v50, %v213_v31 }
  0xae   : > { %v274_v57 = vsel %vm273_vm1, %v272_v54, %v217_v30 }
  0xaf   : > { %v341_v32 = vpop.permute.xlu1 %340 }
  0xb0   : > { %v337_v33 = vpop.permute.xlu0 %336 }
  0xb1   : > { %v395_v55 = vsel %vm271_vm0, %v542_v51, %v337_v33 }
  0xb2   : > { %v396_v56 = vsel %vm273_vm1, %v395_v55, %v341_v32 }
  0xb3   : > { %v345_v34 = vpop.permute.xlu1 %344 }
  0xb4   : > { %v221_v35 = vpop.permute.xlu0 %220  ;;  %v397_v60 = vsel %vm275_vm2, %v396_v56, %v345_v34 }
  0xb5   : > { %v276_v61 = vsel %vm275_vm2, %v274_v57, %v221_v35 }
  0xb7   : > { %v349_v36 = vpop.permute.xlu1 %348 }
  0xb8   : > { %v225_v37 = vpop.permute.xlu0 %224  ;;  %v398_v62 = vsel %vm277_vm3, %v397_v60, %v349_v36 }
  0xb9   : > { %v278_v63 = vsel %vm277_vm3, %v276_v61, %v225_v37 }
  0xbb   : > { %v353_v38 = vpop.permute.xlu1 %352 }
  0xbc   : > { %v229_v39 = vpop.permute.xlu0 %228  ;;  %v399_v0 = vsel %vm279_vm4, %v398_v62, %v353_v38 }
  0xbd   : > { %v280_v1 = vsel %vm279_vm4, %v278_v63, %v229_v39 }
  0xbf   : > { %v357_v40 = vpop.permute.xlu1 %356 }
  0xc0   : > { %v233_v41 = vpop.permute.xlu0 %232  ;;  %v400_v2 = vsel %vm281_vm5, %v399_v0, %v357_v40 }
  0xc1   : > { %v282_v3 = vsel %vm281_vm5, %v280_v1, %v233_v41 }
  0xc3   : > { %v361_v42 = vpop.permute.xlu1 %360 }
  0xc4   : > { %v237_v43 = vpop.permute.xlu0 %236  ;;  %v401_v6 = vsel %vm283_vm6, %v400_v2, %v361_v42 }
  0xc5   : > { %v284_v7 = vsel %vm283_vm6, %v282_v3, %v237_v43 }
  0xc7   : > { %v365_v44 = vpop.permute.xlu1 %364 }
  0xc8   : > { %v241_v45 = vpop.permute.xlu0 %240  ;;  %v402_v8 = vsel %vm285_vm7, %v401_v6, %v365_v44 }
  0xc9   : > { %v286_v9 = vsel %vm285_vm7, %v284_v7, %v241_v45 }
  0xcb   : > { %v369_v46 = vpop.permute.xlu1 %368 }
  0xcc   : > { %v245_v47 = vpop.permute.xlu0 %244  ;;  %v403_v10 = vsel %vm287_vm8, %v402_v8, %v369_v46 }
  0xcd   : > { %v288_v11 = vsel %vm287_vm8, %v286_v9, %v245_v47 }
  0xcf   : > { %v373_v48 = vpop.permute.xlu1 %372 }
  0xd0   : > { %v249_v49 = vpop.permute.xlu0 %248  ;;  %v404_v12 = vsel %vm289_vm9, %v403_v10, %v373_v48 }
  0xd1   : > { %v290_v13 = vsel %vm289_vm9, %v288_v11, %v249_v49 }
  0xd3   : > { %v377_v52 = vpop.permute.xlu1 %376 }
  0xd4   : > { %v253_v53 = vpop.permute.xlu0 %252  ;;  %v405_v16 = vsel %vm291_vm10, %v404_v12, %v377_v52 }
  0xd5   : > { %v292_v17 = vsel %vm291_vm10, %v290_v13, %v253_v53 }
  0xd7   : > { %v381_v58 = vpop.permute.xlu1 %380 }
  0xd8   : > { %v257_v59 = vpop.permute.xlu0 %256  ;;  %v406_v18 = vsel %vm293_vm11, %v405_v16, %v381_v58 }
  0xd9   : > { %v294_v19 = vsel %vm293_vm11, %v292_v17, %v257_v59 }
  0xdb   : > { %v385_v4 = vpop.permute.xlu1 %384 }
  0xdc   : > { %v261_v5 = vpop.permute.xlu0 %260  ;;  %v407_v20 = vsel %vm295_vm12, %v406_v18, %v385_v4 }
  0xdd   : > { %v296_v21 = vsel %vm295_vm12, %v294_v19, %v261_v5 }
  0xdf   : > { %v389_v14 = vpop.permute.xlu1 %388 }
  0xe0   : > { %v265_v15 = vpop.permute.xlu0 %264  ;;  %v408_v22 = vsel %vm297_vm13, %v407_v20, %v389_v14 }
  0xe1   : > { %v298_v23 = vsel %vm297_vm13, %v296_v21, %v265_v15 }
  0xe3   : > { %v393_v24 = vpop.permute.xlu1 %392 }
  0xe4   : > { %v269_v25 = vpop.permute.xlu0 %268  ;;  %v409_v26 = vsel %vm299_vm14, %v408_v22, %v393_v24 }
  0xe5   : > { %v300_v27 = vsel %vm299_vm14, %v298_v23, %v269_v25  ;;  %410 = vst.msk [vmem:[%s178_s4 + $0x4] sm:$0xf] %vm301_vm15, %v409_v26 }
  0xe6   : > { %302 = vst.msk [vmem:[%s178_s4] sm:$0xf] %vm301_vm15, %v300_v27 }
  0xe7   : > { %678 = shalt.err (!%p675_p10)
}
  0xe8   : > { %s679_s5 = scalar_lea.hbm %s949_s30, 128  ;;  %s683_s19 = scalar_lea.hbm %s1004_s1, 512 }
  0xe9   : > { %p680_p11 = scmp.ne.s32.totalorder %s949_s30, %s679_s5  ;;  %p684_p1 = scmp.lt.u32.totalorder %s949_s30, %s1004_s1 }
  0xea   : > { %p685_p2 = scmp.lt.u32.totalorder %s683_s19, %s679_s5  ;;  %p687_p4 = scmp.lt.u32.totalorder %s679_s5, %s949_s30 }
  0xeb   : > { %p681_p13 = pnand %p680_p11, %p861_p9 }
  0xec   : > { %p686_p3 = por %p685_p2, %p684_p1 }
  0xed   : > { %p682_p0 = pneg %p681_p13 }
  0xee   : > { %p688_p5 = por %p687_p4, %p686_p3 }
  0xf0   : > { %p689_p6 = pnand %p688_p5, %p682_p0 }
  0xf2   : > { %692 = shalt.err (!%p689_p6)
}
  0xf3   : > { %573 = dma.vmem_to_hbm [thread:$0]  (%p861_p9), %s951_s28, 128, %s949_s30, %s412_s2  }
  0xf4 PF: > { %p579_p7 = scmp.ge.s32.totalorder %s763_s13, 2  ;;  %s439_s20 = sand.u32 1, %s735_s6  }
  0xf5   : > { %s440_s10 = scalar_lea.sflag [#allocation4], %s439_s20 }
  0xf6   : > { %p576_p8 = pnand %p579_p7, %p868_p12 }
  0xf8   : > { %730 = dma.done.wait (!%p576_p8), %s440_s10, 128  }
  0xf9   : > { %732 = vsyncadd (!%p576_p8), %s440_s10, 4294967168  ;;  %s17_s13 = sadd.s32 1, %s763_s13   ;;  %s1009_s6 = smov %s739_s7 }
  0xfa   : > { %p14_p10 = scmp.ge.s32.totalorder %s17_s13, 6   ;;  %s1010_s7 = smov %s743_s8 }
  0xfb   : > { %s1011_s8 = smov %s873_s26  ;;  %s1012_s9 = smov %s755_s11 }
  0xfc   : > { %s1013_s10 = smov %s759_s12  ;;  %s1014_s11 = smov %s1017_s16 }
  0xfd   : > { %s1015_s12 = smov %s1021_s17  ;;  %16 = sbr.rel (!%p14_p10) target bundleno = 7 (0x7), region = 105 }
 0x104   :  { %445 = vsyncpa [#allocation3], 1 }
 0x105   :  { %447 = vsyncpa [#allocation3 + $0x1], 1 }
 0x106   :  { %448 = vsyncpa [#allocation4], 1 }
 0x107   :  { %450 = vsyncpa [#allocation4 + $0x1], 1 }

</bundles_post_ra>
